<compile_context>
chip_gen: v7x
topology: tpu7x:2x2x1
jax: 0.10.0
libtpu: 0.0.40
codegen_flags: <defaults>
</compile_context>

<pallas_src>
import functools

import jax
import jax.numpy as jnp
from jax.experimental import pallas as pl
from jax.experimental.pallas import tpu as pltpu


def scone_kernel(x_ref, b1_ref, b1t_ref, b2_ref, b2t_ref,
                 w0_ref, w1_ref, w2_ref, o_ref, *, compute_dtype):
    cdt = compute_dtype
    f32 = jnp.float32

    x = x_ref[...].astype(cdt)        # [E, Cin]
    # int8 {-1,0,+1} incidences -> compute dtype (exact; a handful of VPU
    # casts, fully hidden).  Pre-transposed orientations are passed in so all
    # dots below are native [M,K]@[K,N] MXU issues (no vxpose risk).
    b1 = b1_ref[...].astype(cdt)      # [N, E]
    b1t = b1t_ref[...].astype(cdt)    # [E, N]
    b2 = b2_ref[...].astype(cdt)      # [E, T]
    b2t = b2t_ref[...].astype(cdt)    # [T, E]
    w0 = w0_ref[...].astype(cdt)      # [Cin, Cout]
    w1 = w1_ref[...].astype(cdt)
    w2 = w2_ref[...].astype(cdt)

    # Laplacian applied BEFORE the weights (fewer FLOPs when Cout > Cin).
    # Down path: u3 = B1ᵀ (B1 x)
    t1 = jnp.dot(b1, x, preferred_element_type=f32)                   # [N, Cin]
    u3 = jnp.dot(b1t, t1.astype(cdt), preferred_element_type=f32)     # [E, Cin]
    # Up path: u1 = B2 (B2ᵀ x)
    t2 = jnp.dot(b2t, x, preferred_element_type=f32)                  # [T, Cin]
    u1 = jnp.dot(b2, t2.astype(cdt), preferred_element_type=f32)      # [E, Cin]

    # Three weight dots summed -- no in-kernel lane concatenate (the concat
    # was the only cross-lane data-movement op and its XLU/select cost rivals
    # the single MXU issue it saved at these sizes).
    z = (jnp.dot(u3.astype(cdt), w0, preferred_element_type=f32)
         + jnp.dot(x, w1, preferred_element_type=f32)
         + jnp.dot(u1.astype(cdt), w2, preferred_element_type=f32))   # [E, Cout]

    o_ref[...] = jnp.tanh(z).astype(o_ref.dtype)


def prepare_incidences(incidence_1, incidence_2):
    """One-time prep (hoisted out of the per-call path).

    Packs the {-1,0,+1} incidence matrices as int8 (exact, minimal HBM->VMEM
    DMA) and pre-transposes them so the kernel only performs native-orientation
    MXU dots.
    """
    b1 = incidence_1.astype(jnp.int8)   # [N, E]
    b2 = incidence_2.astype(jnp.int8)   # [E, T]
    return b1, b1.T, b2, b2.T


def scone_layer(x, b1_i8, b1t_i8, b2_i8, b2t_i8, w0, w1, w2, *,
                compute_dtype=jnp.float32, out_dtype=jnp.float32):
    """SCoNe forward.

    x:  [E, Cin] or [B, E, Cin]  edge features (B feature sets over the same
        simplicial complex are batched along a "parallel" grid axis).
    b1_i8/b1t_i8/b2_i8/b2t_i8: int8 incidences from prepare_incidences().
    w0/w1/w2: [Cin, Cout] weights.
    """
    squeeze = x.ndim == 2
    if squeeze:
        x = x[None]
    batch, n_edges, in_ch = x.shape
    n_nodes = b1_i8.shape[0]
    n_tri = b2_i8.shape[1]
    out_ch = w0.shape[1]

    flops_per_graph = (4 * n_nodes * n_edges * in_ch        # B1 chain
                       + 4 * n_edges * n_tri * in_ch        # B2 chain
                       + 6 * n_edges * in_ch * out_ch)      # weight dots
    bytes_accessed = (x.size * x.dtype.itemsize
                      + 2 * n_nodes * n_edges + 2 * n_edges * n_tri   # int8
                      + 3 * in_ch * out_ch * w0.dtype.itemsize
                      + batch * n_edges * out_ch * jnp.dtype(out_dtype).itemsize)

    # Inputs shared across the batch: constant block index -> stay resident in
    # VMEM across grid steps (no per-step re-DMA).
    def fixed(a):
        return pl.BlockSpec(a.shape, lambda b: (0,) * a.ndim)

    out = pl.pallas_call(
        functools.partial(scone_kernel, compute_dtype=compute_dtype),
        out_shape=jax.ShapeDtypeStruct((batch, n_edges, out_ch), out_dtype),
        grid=(batch,),
        in_specs=[
            pl.BlockSpec((None, n_edges, in_ch), lambda b: (b, 0, 0)),  # x
            fixed(b1_i8), fixed(b1t_i8), fixed(b2_i8), fixed(b2t_i8),
            fixed(w0), fixed(w1), fixed(w2),
        ],
        out_specs=pl.BlockSpec((None, n_edges, out_ch), lambda b: (b, 0, 0)),
        compiler_params=pltpu.CompilerParams(
            dimension_semantics=("parallel",),   # shards batch across v7x TCs
            vmem_limit_bytes=16 << 20),          # == v5e default; >> working set
        cost_estimate=pl.CostEstimate(
            flops=batch * flops_per_graph,
            transcendentals=batch * n_edges * out_ch,
            bytes_accessed=bytes_accessed),
    )(x, b1_i8, b1t_i8, b2_i8, b2t_i8, w0, w1, w2)

    return out[0] if squeeze else out


def xavier_uniform(key, fan_in, fan_out, gain=1.0):
    bound = gain * jnp.sqrt(6.0 / (fan_in + fan_out))
    return jax.random.uniform(
        key, (fan_in, fan_out), dtype=jnp.float32, minval=-bound, maxval=bound
    )


def build_incidences(n_nodes, n_edges, n_triangles):
    """Deterministic signed boundary maps with entries in {-1, 0, +1}."""
    e = jnp.arange(n_edges)
    tails = e % n_nodes
    heads = (3 * e + 1) % n_nodes  # never equals tails (parity argument)
    b1 = jnp.zeros((n_nodes, n_edges), jnp.float32)
    b1 = b1.at[tails, e].set(-1.0).at[heads, e].set(1.0)

    t = jnp.arange(n_triangles)
    tri_edges = (3 * t[:, None] + jnp.arange(3)[None, :]) % n_edges  # [T, 3]
    signs = jnp.array([1.0, -1.0, 1.0], jnp.float32)
    b2 = jnp.zeros((n_edges, n_triangles), jnp.float32)
    b2 = b2.at[tri_edges.ravel(), jnp.repeat(t, 3)].set(
        jnp.tile(signs, n_triangles)
    )
    return b1, b2


if __name__ == "__main__":
    # Small synthetic simplicial complex, batched feature sets over it.
    n_nodes, n_edges, n_triangles = 64, 128, 16
    in_channels, out_channels = 16, 32
    batch = 4

    key = jax.random.PRNGKey(0)
    k_x, k_w0, k_w1, k_w2 = jax.random.split(key, 4)

    x = 0.5 * jax.random.normal(
        k_x, (batch, n_edges, in_channels), dtype=jnp.float32)
    b1_f32, b2_f32 = build_incidences(n_nodes, n_edges, n_triangles)

    # One-time parameter / incidence prep (hoisted out of the call path).
    b1_i8, b1t_i8, b2_i8, b2t_i8 = prepare_incidences(b1_f32, b2_f32)
    w0 = xavier_uniform(k_w0, in_channels, out_channels)
    w1 = xavier_uniform(k_w1, in_channels, out_channels)
    w2 = xavier_uniform(k_w2, in_channels, out_channels)

    out = jax.block_until_ready(
        scone_layer(x, b1_i8, b1t_i8, b2_i8, b2t_i8, w0, w1, w2))

    # Pure-JAX f32 reference using the PyTorch forward's exact formula.
    def ref_single(xb):
        return jnp.tanh(
            (b2_f32 @ b2_f32.T @ xb @ w2)
            + (xb @ w1)
            + (b1_f32.T @ b1_f32 @ xb @ w0))
    ref = jax.vmap(ref_single)(x)

    assert out.shape == (batch, n_edges, out_channels)
    # f32 compute path: much tighter tolerance than the previous bf16 version.
    assert jnp.allclose(out, ref, atol=1e-2, rtol=1e-2), float(
        jnp.max(jnp.abs(out - ref))
    )

    print("KERNEL_OK")
</pallas_src>

<mosaic_0001>
module attributes {stable_mosaic.version = 11 : i64} {
  func.func @scone_kernel(%arg0: i32, %arg1: memref<1x128x16xf32, #tpu.memory_space<vmem>>, %arg2: memref<64x128xi8, #tpu.memory_space<vmem>>, %arg3: memref<128x64xi8, #tpu.memory_space<vmem>>, %arg4: memref<128x16xi8, #tpu.memory_space<vmem>>, %arg5: memref<16x128xi8, #tpu.memory_space<vmem>>, %arg6: memref<16x32xf32, #tpu.memory_space<vmem>>, %arg7: memref<16x32xf32, #tpu.memory_space<vmem>>, %arg8: memref<16x32xf32, #tpu.memory_space<vmem>>, %arg9: memref<1x128x32xf32, #tpu.memory_space<vmem>>) attributes {dimension_semantics = [#tpu.dimension_semantics<parallel>], iteration_bounds = array<i64: 4>, scalar_prefetch = 0 : i64, scratch_operands = 0 : i64, tpu.core_type = #tpu.core_type<tc>, window_params = [{transform_indices = @transform_0, window_bounds = array<i64: 1, 128, 16>}, {pipeline_mode = #tpu.pipeline_mode<synchronous>, transform_indices = @transform_1, window_bounds = array<i64: 64, 128>}, {pipeline_mode = #tpu.pipeline_mode<synchronous>, transform_indices = @transform_2, window_bounds = array<i64: 128, 64>}, {pipeline_mode = #tpu.pipeline_mode<synchronous>, transform_indices = @transform_3, window_bounds = array<i64: 128, 16>}, {pipeline_mode = #tpu.pipeline_mode<synchronous>, transform_indices = @transform_4, window_bounds = array<i64: 16, 128>}, {pipeline_mode = #tpu.pipeline_mode<synchronous>, transform_indices = @transform_5, window_bounds = array<i64: 16, 32>}, {pipeline_mode = #tpu.pipeline_mode<synchronous>, transform_indices = @transform_6, window_bounds = array<i64: 16, 32>}, {pipeline_mode = #tpu.pipeline_mode<synchronous>, transform_indices = @transform_7, window_bounds = array<i64: 16, 32>}, {transform_indices = @transform_8, window_bounds = array<i64: 1, 128, 32>}]} {
    %c0 = arith.constant 0 : index
    %c0_0 = arith.constant 0 : index
    %c0_1 = arith.constant 0 : index
    %0 = vector.load %arg1[%c0, %c0_0, %c0_1] : memref<1x128x16xf32, #tpu.memory_space<vmem>>, vector<1x128x16xf32>
    %1 = vector.shape_cast %0 : vector<1x128x16xf32> to vector<128x16xf32>
    %c0_2 = arith.constant 0 : index
    %c0_3 = arith.constant 0 : index
    %2 = vector.load %arg2[%c0_2, %c0_3] : memref<64x128xi8, #tpu.memory_space<vmem>>, vector<64x128xi8>
    %3 = arith.sitofp %2 : vector<64x128xi8> to vector<64x128xf32>
    %c0_4 = arith.constant 0 : index
    %c0_5 = arith.constant 0 : index
    %4 = vector.load %arg3[%c0_4, %c0_5] : memref<128x64xi8, #tpu.memory_space<vmem>>, vector<128x64xi8>
    %5 = arith.sitofp %4 : vector<128x64xi8> to vector<128x64xf32>
    %c0_6 = arith.constant 0 : index
    %c0_7 = arith.constant 0 : index
    %6 = vector.load %arg4[%c0_6, %c0_7] : memref<128x16xi8, #tpu.memory_space<vmem>>, vector<128x16xi8>
    %7 = arith.sitofp %6 : vector<128x16xi8> to vector<128x16xf32>
    %c0_8 = arith.constant 0 : index
    %c0_9 = arith.constant 0 : index
    %8 = vector.load %arg5[%c0_8, %c0_9] : memref<16x128xi8, #tpu.memory_space<vmem>>, vector<16x128xi8>
    %9 = arith.sitofp %8 : vector<16x128xi8> to vector<16x128xf32>
    %c0_10 = arith.constant 0 : index
    %c0_11 = arith.constant 0 : index
    %10 = vector.load %arg6[%c0_10, %c0_11] : memref<16x32xf32, #tpu.memory_space<vmem>>, vector<16x32xf32>
    %c0_12 = arith.constant 0 : index
    %c0_13 = arith.constant 0 : index
    %11 = vector.load %arg7[%c0_12, %c0_13] : memref<16x32xf32, #tpu.memory_space<vmem>>, vector<16x32xf32>
    %c0_14 = arith.constant 0 : index
    %c0_15 = arith.constant 0 : index
    %12 = vector.load %arg8[%c0_14, %c0_15] : memref<16x32xf32, #tpu.memory_space<vmem>>, vector<16x32xf32>
    %cst = arith.constant dense<0.000000e+00> : vector<64x16xf32>
    %13 = tpu.matmul %3, %1, %cst {dimension_numbers = #tpu.dot_dimension_numbers<[1], [0], [0], [1], [0, 0, 1, 1], [], []>} : vector<64x128xf32>, vector<128x16xf32>, vector<64x16xf32> -> vector<64x16xf32>
    %cst_16 = arith.constant dense<0.000000e+00> : vector<128x16xf32>
    %14 = tpu.matmul %5, %13, %cst_16 {dimension_numbers = #tpu.dot_dimension_numbers<[1], [0], [0], [1], [0, 0, 1, 1], [], []>} : vector<128x64xf32>, vector<64x16xf32>, vector<128x16xf32> -> vector<128x16xf32>
    %cst_17 = arith.constant dense<0.000000e+00> : vector<16x16xf32>
    %15 = tpu.matmul %9, %1, %cst_17 {dimension_numbers = #tpu.dot_dimension_numbers<[1], [0], [0], [1], [0, 0, 1, 1], [], []>} : vector<16x128xf32>, vector<128x16xf32>, vector<16x16xf32> -> vector<16x16xf32>
    %cst_18 = arith.constant dense<0.000000e+00> : vector<128x16xf32>
    %16 = tpu.matmul %7, %15, %cst_18 {dimension_numbers = #tpu.dot_dimension_numbers<[1], [0], [0], [1], [0, 0, 1, 1], [], []>} : vector<128x16xf32>, vector<16x16xf32>, vector<128x16xf32> -> vector<128x16xf32>
    %cst_19 = arith.constant dense<0.000000e+00> : vector<128x32xf32>
    %17 = tpu.matmul %14, %10, %cst_19 {dimension_numbers = #tpu.dot_dimension_numbers<[1], [0], [0], [1], [0, 0, 1, 1], [], []>} : vector<128x16xf32>, vector<16x32xf32>, vector<128x32xf32> -> vector<128x32xf32>
    %cst_20 = arith.constant dense<0.000000e+00> : vector<128x32xf32>
    %18 = tpu.matmul %1, %11, %cst_20 {dimension_numbers = #tpu.dot_dimension_numbers<[1], [0], [0], [1], [0, 0, 1, 1], [], []>} : vector<128x16xf32>, vector<16x32xf32>, vector<128x32xf32> -> vector<128x32xf32>
    %19 = arith.addf %17, %18 : vector<128x32xf32>
    %cst_21 = arith.constant dense<0.000000e+00> : vector<128x32xf32>
    %20 = tpu.matmul %16, %12, %cst_21 {dimension_numbers = #tpu.dot_dimension_numbers<[1], [0], [0], [1], [0, 0, 1, 1], [], []>} : vector<128x16xf32>, vector<16x32xf32>, vector<128x32xf32> -> vector<128x32xf32>
    %21 = arith.addf %19, %20 : vector<128x32xf32>
    %22 = math.tanh %21 : vector<128x32xf32>
    %c0_22 = arith.constant 0 : index
    %c0_23 = arith.constant 0 : index
    %c0_24 = arith.constant 0 : index
    %23 = vector.load %arg9[%c0_22, %c0_23, %c0_24] : memref<1x128x32xf32, #tpu.memory_space<vmem>>, vector<1x128x32xf32>
    %24 = vector.shape_cast %23 : vector<1x128x32xf32> to vector<128x32xf32>
    %25 = vector.shape_cast %22 : vector<128x32xf32> to vector<1x128x32xf32>
    tpu.vector_store %arg9[%c0_22, %c0_23, %c0_24], %25 {strides = array<i32>} : memref<1x128x32xf32, #tpu.memory_space<vmem>>, vector<1x128x32xf32>,
    return
  }
  func.func @transform_0(%arg0: i32) -> (i32, i32, i32) {
    %c0_i32 = arith.constant 0 : i32
    %c0_i32_0 = arith.constant 0 : i32
    %c0_i32_1 = arith.constant 0 : i32
    return %arg0, %c0_i32, %c0_i32_0 : i32, i32, i32
  }
  func.func @transform_1(%arg0: i32) -> (i32, i32) {
    %c0_i32 = arith.constant 0 : i32
    %c0_i32_0 = arith.constant 0 : i32
    %c0_i32_1 = arith.constant 0 : i32
    return %c0_i32, %c0_i32_0 : i32, i32
  }
  func.func @transform_2(%arg0: i32) -> (i32, i32) {
    %c0_i32 = arith.constant 0 : i32
    %c0_i32_0 = arith.constant 0 : i32
    %c0_i32_1 = arith.constant 0 : i32
    return %c0_i32, %c0_i32_0 : i32, i32
  }
  func.func @transform_3(%arg0: i32) -> (i32, i32) {
    %c0_i32 = arith.constant 0 : i32
    %c0_i32_0 = arith.constant 0 : i32
    %c0_i32_1 = arith.constant 0 : i32
    return %c0_i32, %c0_i32_0 : i32, i32
  }
  func.func @transform_4(%arg0: i32) -> (i32, i32) {
    %c0_i32 = arith.constant 0 : i32
    %c0_i32_0 = arith.constant 0 : i32
    %c0_i32_1 = arith.constant 0 : i32
    return %c0_i32, %c0_i32_0 : i32, i32
  }
  func.func @transform_5(%arg0: i32) -> (i32, i32) {
    %c0_i32 = arith.constant 0 : i32
    %c0_i32_0 = arith.constant 0 : i32
    %c0_i32_1 = arith.constant 0 : i32
    return %c0_i32, %c0_i32_0 : i32, i32
  }
  func.func @transform_6(%arg0: i32) -> (i32, i32) {
    %c0_i32 = arith.constant 0 : i32
    %c0_i32_0 = arith.constant 0 : i32
    %c0_i32_1 = arith.constant 0 : i32
    return %c0_i32, %c0_i32_0 : i32, i32
  }
  func.func @transform_7(%arg0: i32) -> (i32, i32) {
    %c0_i32 = arith.constant 0 : i32
    %c0_i32_0 = arith.constant 0 : i32
    %c0_i32_1 = arith.constant 0 : i32
    return %c0_i32, %c0_i32_0 : i32, i32
  }
  func.func @transform_8(%arg0: i32) -> (i32, i32, i32) {
    %c0_i32 = arith.constant 0 : i32
    %c0_i32_0 = arith.constant 0 : i32
    %c0_i32_1 = arith.constant 0 : i32
    return %arg0, %c0_i32, %c0_i32_0 : i32, i32, i32
  }
}

</mosaic_0001>

<bundles_post_ra>
// kernel: tpu_custom_call.1
= control target key start
LH: loop header
LB: loop body
LE: loop exit
PB: predicated region body
PF: predicated region fallthrough
CT: control target
= control target key end

     0   :  { %s2362_s27 = smov 0   ;;  %s2687_s0 = inlined_call_operand.vmem [shape: f32[4,128,16], index: 0, kind: input, shape index: {}]   ;;  %s2688_s1 = inlined_call_operand.vmem [shape: s8[64,128], index: 1, kind: input, shape index: {}]   ;;  %s2689_s2 = inlined_call_operand.vmem [shape: s8[128,64], index: 2, kind: input, shape index: {}]   ;;  %s2690_s3 = inlined_call_operand.vmem [shape: s8[128,16], index: 3, kind: input, shape index: {}]   ;;  %s2691_s4 = inlined_call_operand.vmem [shape: s8[16,128], index: 4, kind: input, shape index: {}]   ;;  %s2692_s5 = inlined_call_operand.vmem [shape: f32[16,32], index: 5, kind: input, shape index: {}]   ;;  %s2693_s6 = inlined_call_operand.vmem [shape: f32[16,32], index: 6, kind: input, shape index: {}]   ;;  %s2694_s7 = inlined_call_operand.vmem [shape: f32[16,32], index: 7, kind: input, shape index: {}]   ;;  %s2695_s8 = inlined_call_operand.vmem [shape: f32[4,128,32], index: 8, kind: output, shape index: {}]  }
   0x1 LB: > { %s1675_s28 = sadd.s32 4294967295, %s2315_s27   ;;  %p1679_p0 = scmp.ge.s32.totalorder %s2315_s27, 1  ;;  %s2315_s27 = sphi %s2362_s27, %s18_s27  }
   0x2   : > { %p262_p1 = scmp.lt.s32.totalorder %s2315_s27, 5 }
   0x4   : > { %p263_p2 = pnand %p1679_p0, %p262_p1 }
   0x5   : > { %p296_p3 = scmp.lt.s32.totalorder (!%p263_p2), %s1675_s28, 3  ;;  %v322_v0 = vld [vmem:[%s2688_s1] sm:$0xff] (!%p263_p2)  ;;  %v323_v29 = vld [vmem:[%s2688_s1 + $0x8] sm:$0xff] (!%p263_p2)  ;;  %vm529_vm0 = vcmask (!%p263_p2), 523264   ;;  %vm798_vm1 = vcmask (!%p263_p2), 130048   ;;  %vm1603_vm2 = vcmask (!%p263_p2), 261120  }
   0x6   : > { %266 = sbr.rel (%p263_p2) target bundleno = 1002 (0x3ea), region = 52  ;;  %v324_v1 = vunpack.c.0.s8 (!%p263_p2), %v322_v0  ;;  %v325_v27 = vunpack.c.1.s8 (!%p263_p2), %v322_v0  ;;  %v326_v28 = vunpack.c.2.s8 (!%p263_p2), %v322_v0  ;;  %v327_v31 = vunpack.c.3.s8 (!%p263_p2), %v322_v0  ;;  %v340_v42 = vld [vmem:[%s2689_s2] sm:$0xff] (!%p263_p2)  ;;  %v341_v59 = vld [vmem:[%s2689_s2 + $0x8] sm:$0xff] (!%p263_p2) }
   0x7   : > { %v328_v33 = vunpack.c.0.s8 (!%p263_p2), %v323_v29  ;;  %v329_v35 = vunpack.c.1.s8 (!%p263_p2), %v323_v29  ;;  %v330_v37 = vunpack.c.2.s8 (!%p263_p2), %v323_v29  ;;  %v331_v39 = vunpack.c.3.s8 (!%p263_p2), %v323_v29 }
   0x8   : > { %v332_v2 = vcvt.s32.f32 (!%p263_p2), %v324_v1  ;;  %v333_v30 = vcvt.s32.f32 (!%p263_p2), %v325_v27  ;;  %v334_v32 = vcvt.s32.f32 (!%p263_p2), %v326_v28  ;;  %v335_v34 = vcvt.s32.f32 (!%p263_p2), %v327_v31  ;;  %v342_v28 = vld [vmem:[%s2689_s2 + $0x10] sm:$0xff] (!%p263_p2) }
   0x9   : > { %v336_v36 = vcvt.s32.f32 (!%p263_p2), %v328_v33  ;;  %v337_v38 = vcvt.s32.f32 (!%p263_p2), %v329_v35  ;;  %v338_v40 = vcvt.s32.f32 (!%p263_p2), %v330_v37  ;;  %v339_v41 = vcvt.s32.f32 (!%p263_p2), %v331_v39 }
   0xa   : > { %1942 = vmatprep.mubr.f32.mxu0 (!%p263_p2), %v332_v2  ;;  %v344_v43 = vunpack.c.0.s8 (!%p263_p2), %v340_v42  ;;  %v345_v55 = vunpack.c.1.s8 (!%p263_p2), %v340_v42  ;;  %v346_v57 = vunpack.c.2.s8 (!%p263_p2), %v340_v42  ;;  %v347_v61 = vunpack.c.3.s8 (!%p263_p2), %v340_v42 }
   0xb   : > { %v348_v63 = vunpack.c.0.s8 (!%p263_p2), %v341_v59  ;;  %v349_v1 = vunpack.c.1.s8 (!%p263_p2), %v341_v59  ;;  %v350_v27 = vunpack.c.2.s8 (!%p263_p2), %v341_v59  ;;  %v353_v33 = vunpack.c.1.s8 (!%p263_p2), %v342_v28 }
   0xc   : > { %v360_v44 = vcvt.s32.f32 (!%p263_p2), %v344_v43  ;;  %v361_v60 = vcvt.s32.f32 (!%p263_p2), %v345_v55  ;;  %v362_v62 = vcvt.s32.f32 (!%p263_p2), %v346_v57  ;;  %v363_v0 = vcvt.s32.f32 (!%p263_p2), %v347_v61 }
   0xd   : > { %s2697_s28 = smov (!%p296_p3, %s1675_s28), 3  ;;  %v364_v2 = vcvt.s32.f32 %v348_v63  ;;  %v365_v29 = vcvt.s32.f32 %v349_v1  ;;  %v366_v31 = vcvt.s32.f32 %v350_v27  ;;  %v354_v35 = vunpack.c.2.s8 %v342_v28 }
   0xe   : > { %s1766_s9 = sshll.u32 %s2697_s28, 7  ;;  %1970 = vmatprep.mubr.msk.f32.mxu1 %vm529_vm0, %v360_v44  ;;  %v355_v37 = vunpack.c.3.s8 %v342_v28 }
   0xf   : > { %s2381_s12 = scalar_lea.vmem %s2687_s0, %s1766_s9  ;;  %s2648_s30 = scalar_lea.vmem %s2695_s8, %s1766_s9 }
  0x10   : > { %v2384_v3 = vld [vmem:[%s2381_s12] sm:$0xff]  ;;  %v2387_v4 = vld [vmem:[%s2381_s12 + $0x8] sm:$0xff]  ;;  %v2390_v5 = vld [vmem:[%s2381_s12 + $0x10] sm:$0xff]  ;;  %v371_v39 = vcvt.s32.f32 %v355_v37 }
  0x11   : > { %v2394_v6 = vpack.c.bf16 %v2387_v4, %v2384_v3  ;;  %v2397_v7 = vld [vmem:[%s2381_s12 + $0x18] sm:$0xff]  ;;  %v2404_v9 = vld [vmem:[%s2381_s12 + $0x20] sm:$0xff]  ;;  %v2407_v10 = vld [vmem:[%s2381_s12 + $0x28] sm:$0xff] }
  0x12   : > { %v2401_v8 = vpack.c.bf16 %v2397_v7, %v2390_v5  ;;  %v2414_v11 = vpack.c.bf16 %v2407_v10, %v2404_v9  ;;  %v2417_v12 = vld [vmem:[%s2381_s12 + $0x30] sm:$0xff]  ;;  %v2420_v13 = vld [vmem:[%s2381_s12 + $0x38] sm:$0xff]  ;;  %v2429_v15 = vld [vmem:[%s2381_s12 + $0x40] sm:$0xff] }
  0x13   : > { %2142 = vmatprep.subr.bf16.mxu0 %v2394_v6  ;;  %v2426_v14 = vpack.c.bf16 %v2420_v13, %v2417_v12  ;;  %v2432_v16 = vld [vmem:[%s2381_s12 + $0x48] sm:$0xff]  ;;  %v2441_v18 = vld [vmem:[%s2381_s12 + $0x50] sm:$0xff]  ;;  %v2444_v19 = vld [vmem:[%s2381_s12 + $0x58] sm:$0xff] }
  0x14   : > { %2144 = vmatpush3.bf16.msra.mxu0 %v2394_v6  ;;  %v2438_v17 = vpack.c.bf16 %v2432_v16, %v2429_v15  ;;  %v2450_v20 = vpack.c.bf16 %v2444_v19, %v2441_v18  ;;  %v2453_v21 = vld [vmem:[%s2381_s12 + $0x60] sm:$0xff]  ;;  %v2456_v22 = vld [vmem:[%s2381_s12 + $0x68] sm:$0xff]  ;;  %v2465_v24 = vld [vmem:[%s2381_s12 + $0x70] sm:$0xff] }
  0x15   : > { %2146 = vmatprep.subr.bf16.mxu0 %v2401_v8  ;;  %v2462_v23 = vpack.c.bf16 %v2456_v22, %v2453_v21  ;;  %v2468_v25 = vld [vmem:[%s2381_s12 + $0x78] sm:$0xff]  ;;  %v377_v37 = vld [vmem:[%s2690_s3 + $0x8] sm:$0xff] }
  0x16   : > { %v2474_v26 = vpack.c.bf16 %v2468_v25, %v2465_v24 }
  0x18   : > { %2148 = vmatpush3.bf16.msra.mxu0 %v2401_v8 }
  0x19   : > { %2150 = vmatprep.subr.bf16.mxu0 %v2414_v11 }
  0x1c   : > { %2152 = vmatpush3.bf16.msra.mxu0 %v2414_v11 }
  0x1d   : > { %2154 = vmatprep.subr.bf16.mxu0 %v2426_v14 }
  0x20   : > { %2156 = vmatpush3.bf16.msra.mxu0 %v2426_v14 }
  0x21   : > { %2158 = vmatprep.subr.bf16.mxu0 %v2438_v17 }
  0x24   : > { %2160 = vmatpush3.bf16.msra.mxu0 %v2438_v17 }
  0x25   : > { %2162 = vmatprep.subr.bf16.mxu0 %v2450_v20 }
  0x28   : > { %2164 = vmatpush3.bf16.msra.mxu0 %v2450_v20 }
  0x29   : > { %2166 = vmatprep.subr.bf16.mxu0 %v2462_v23 }
  0x2c   : > { %2168 = vmatpush3.bf16.msra.mxu0 %v2462_v23 }
  0x2d   : > { %2170 = vmatprep.subr.bf16.mxu0 %v2474_v26 }
  0x30   : > { %2172 = vmatpush3.bf16.msra.mxu0 %v2474_v26 }
  0x33   : > { %1943 = vmatmul.mubr.f32.vlgmr.msra.gmra.mrb[0].mxu0 %v333_v30  ;;  %v351_v30 = vunpack.c.3.s8 %v341_v59 }
  0x34   : > { %1945 = vmatprep.mubr.f32.mxu0 %v334_v32 }
  0x35   : > { %v367_v32 = vcvt.s32.f32 %v351_v30 }
  0x37   : > { %1946 = vmatmul.mubr.f32.gmra.mrb[2].mxu0 %v335_v34 }
  0x38   : > { %1948 = vmatprep.mubr.f32.mxu0 %v336_v36  ;;  %v369_v36 = vcvt.s32.f32 %v353_v33 }
  0x3b   : > { %1949 = vmatmul.mubr.f32.gmra.mrb[4].mxu0 %v337_v38  ;;  %v370_v38 = vcvt.s32.f32 %v354_v35 }
  0x3c   : > { %1951 = vmatprep.mubr.f32.mxu0 %v338_v40 }
  0x3f   : > { %1952 = vmatmul.mubr.f32.gmra.mrb[6].mxu0 %v339_v41 }
 0x106   : > { %v1944_v45 = vpop.f32.mrb[0].mxu0 }
 0x107   : > { %v490_v46 = vpop.f32.mrb[1].mxu0 }
 0x108   : > { %v2173_v47 = vpack.c.bf16 %v1944_v45, %v490_v46  ;;  %v418_v46 = vld [vmem:[%s2692_s5] sm:$0xff] }
 0x10a   : > { %v1947_v48 = vpop.f32.mrb[2].mxu0  ;;  %2174 = vmatprep.subr.bf16.mxu1 %v2173_v47 }
 0x10b   : > { %v500_v49 = vpop.f32.mrb[3].mxu0  ;;  %2176 = vmatpush3.bf16.msra.mxu1 %v2173_v47  ;;  %v419_v47 = vld [vmem:[%s2692_s5 + $0x8] sm:$0xff] }
 0x10c   : > { %v2177_v50 = vpack.c.bf16 %v1947_v48, %v500_v49 }
 0x10e   : > { %v1950_v51 = vpop.f32.mrb[4].mxu0  ;;  %2178 = vmatprep.subr.bf16.mxu1 %v2177_v50 }
 0x10f   : > { %v510_v52 = vpop.f32.mrb[5].mxu0  ;;  %2180 = vmatpush3.bf16.msra.mxu1 %v2177_v50  ;;  %v2229_v50 = vpack.c.bf16 %v419_v47, %v418_v46  ;;  %v387_v46 = vunpack.c.3.s8 %v377_v37 }
 0x110   : > { %v2181_v53 = vpack.c.bf16 %v1950_v51, %v510_v52  ;;  %v376_v52 = vld [vmem:[%s2690_s3] sm:$0xff] }
 0x112   : > { %v1953_v54 = vpop.f32.mrb[6].mxu0  ;;  %2182 = vmatprep.subr.bf16.mxu1 %v2181_v53 }
 0x113   : > { %v520_v56 = vpop.f32.mrb[7].mxu0  ;;  %2184 = vmatpush3.bf16.msra.mxu1 %v2181_v53 }
 0x114   : > { %v2185_v58 = vpack.c.bf16 %v1953_v54, %v520_v56  ;;  %v422_v54 = vld [vmem:[%s2694_s7] sm:$0xff] }
 0x116   : > { %2186 = vmatprep.subr.bf16.mxu1 %v2185_v58 }
 0x117   : > { %2188 = vmatpush3.bf16.msra.mxu1 %v2185_v58 }
 0x118   : > { %2190 = vmatprep.subr.bf16.mxu1 %v2394_v6 }
 0x11a   : > { %1971 = vmatmul.mubr.msk.f32.vlgmr.msra.gmra.mrb[0].mxu1 %vm529_vm0, %v361_v60 }
 0x11b   : > { %2192 = vmatpush3.bf16.msra.mxu1 %v2394_v6  ;;  %1973 = vmatprep.mubr.msk.f32.mxu1 %vm529_vm0, %v362_v62  ;;  %v352_v6 = vunpack.c.0.s8 %v342_v28 }
 0x11c   : > { %2194 = vmatprep.subr.bf16.mxu1 %v2401_v8 }
 0x11d   : > { %v368_v34 = vcvt.s32.f32 %v352_v6  ;;  %v420_v6 = vld [vmem:[%s2693_s6] sm:$0xff] }
 0x11e   : > { %1974 = vmatmul.mubr.msk.f32.gmra.mrb[2].mxu1 %vm529_vm0, %v363_v0 }
 0x11f   : > { %2196 = vmatpush3.bf16.msra.mxu1 %v2401_v8  ;;  %1976 = vmatprep.mubr.msk.f32.mxu1 %vm529_vm0, %v364_v2  ;;  %v343_v8 = vld [vmem:[%s2689_s2 + $0x18] sm:$0xff] }
 0x120   : > { %2198 = vmatprep.subr.bf16.mxu1 %v2414_v11  ;;  %v357_v40 = vunpack.c.1.s8 %v343_v8  ;;  %v358_v42 = vunpack.c.2.s8 %v343_v8  ;;  %v359_v44 = vunpack.c.3.s8 %v343_v8 }
 0x122   : > { %1977 = vmatmul.mubr.msk.f32.gmra.mrb[4].mxu1 %vm529_vm0, %v365_v29  ;;  %v373_v43 = vcvt.s32.f32 %v357_v40  ;;  %v374_v45 = vcvt.s32.f32 %v358_v42  ;;  %v375_v48 = vcvt.s32.f32 %v359_v44  ;;  %v386_v44 = vunpack.c.2.s8 %v377_v37 }
 0x123   : > { %2200 = vmatpush3.bf16.msra.mxu1 %v2414_v11  ;;  %1979 = vmatprep.mubr.msk.f32.mxu1 %vm529_vm0, %v366_v31  ;;  %v356_v11 = vunpack.c.0.s8 %v343_v8  ;;  %v382_v8 = vunpack.c.2.s8 %v376_v52 }
 0x124   : > { %2202 = vmatprep.subr.bf16.mxu1 %v2426_v14  ;;  %v402_v47 = vcvt.s32.f32 %v386_v44 }
 0x125   : > { %v372_v41 = vcvt.s32.f32 %v356_v11  ;;  %v398_v40 = vcvt.s32.f32 %v382_v8 }
 0x126   : > { %1980 = vmatmul.mubr.msk.f32.gmra.mrb[6].mxu1 %vm529_vm0, %v367_v32  ;;  %v421_v32 = vld [vmem:[%s2693_s6 + $0x8] sm:$0xff] }
 0x127   : > { %2204 = vmatpush3.bf16.msra.mxu1 %v2426_v14  ;;  %1982 = vmatprep.mubr.msk.f32.mxu1 %vm529_vm0, %v368_v34  ;;  %v1769_v14 = vld [vmem:[%s2691_s4] sm:$0xf]   ;;  %v381_v34 = vunpack.c.1.s8 %v376_v52 }
 0x128   : > { %2206 = vmatprep.subr.bf16.mxu1 %v2438_v17  ;;  %v1771_v49 = vunpack.c.1.s8 %v1769_v14 }
 0x129   : > { %v397_v11 = vcvt.s32.f32 %v381_v34 }
 0x12a   : > { %1983 = vmatmul.mubr.msk.f32.gmra.mrb[8].mxu1 %vm529_vm0, %v369_v36  ;;  %v417_v51 = vcvt.s32.f32 %v1771_v49  ;;  %v403_v49 = vcvt.s32.f32 %v387_v46 }
 0x12b   : > { %2208 = vmatpush3.bf16.msra.mxu1 %v2438_v17  ;;  %1985 = vmatprep.mubr.msk.f32.mxu1 %vm529_vm0, %v370_v38  ;;  %v1770_v17 = vunpack.c.0.s8 %v1769_v14  ;;  %v2225_v38 = vpack.c.bf16 %v421_v32, %v420_v6  ;;  %v385_v14 = vunpack.c.1.s8 %v377_v37 }
 0x12c   : > { %2210 = vmatprep.subr.bf16.mxu1 %v2450_v20 }
 0x12e   : > { %1986 = vmatmul.mubr.msk.f32.gmra.mrb[10].mxu1 %vm529_vm0, %v371_v39  ;;  %v383_v39 = vunpack.c.3.s8 %v376_v52 }
 0x12f   : > { %2212 = vmatpush3.bf16.msra.mxu1 %v2450_v20  ;;  %1988 = vmatprep.mubr.msk.f32.mxu1 %vm529_vm0, %v372_v41  ;;  %v416_v20 = vcvt.s32.f32 %v1770_v17  ;;  %v384_v41 = vunpack.c.0.s8 %v377_v37  ;;  %v401_v17 = vcvt.s32.f32 %v385_v14 }
 0x130   : > { %2214 = vmatprep.subr.bf16.mxu1 %v2462_v23  ;;  %v399_v42 = vcvt.s32.f32 %v383_v39 }
 0x132   : > { %1989 = vmatmul.mubr.msk.f32.gmra.mrb[12].mxu1 %vm529_vm0, %v373_v43  ;;  %v400_v43 = vcvt.s32.f32 %v384_v41 }
 0x133   : > { %2216 = vmatpush3.bf16.msra.mxu1 %v2462_v23  ;;  %1991 = vmatprep.mubr.msk.f32.mxu1 %vm529_vm0, %v374_v45  ;;  %v380_v23 = vunpack.c.0.s8 %v376_v52  ;;  %v378_v45 = vld [vmem:[%s2690_s3 + $0x10] sm:$0xff]  ;;  %v379_v52 = vld [vmem:[%s2690_s3 + $0x18] sm:$0xff] }
 0x134   : > { %2218 = vmatprep.subr.bf16.mxu1 %v2474_v26 }
 0x135   : > { %v396_v53 = vcvt.s32.f32 %v380_v23 }
 0x136   : > { %1992 = vmatmul.mubr.msk.f32.gmra.mrb[14].mxu1 %vm529_vm0, %v375_v48  ;;  %v388_v48 = vunpack.c.0.s8 %v378_v45 }
 0x137   : > { %2220 = vmatpush3.bf16.msra.mxu1 %v2474_v26  ;;  %2026 = vmatprep.mubr.f32.mxu1 %v416_v20  ;;  %v423_v26 = vld [vmem:[%s2694_s7 + $0x8] sm:$0xff]  ;;  %v389_v20 = vunpack.c.1.s8 %v378_v45 }
 0x138   : > { %2230 = vmatprep.subr.bf16.mxu1 %v2229_v50  ;;  %2033 = vmatprep.mubr.msk.f32.mxu0 %vm798_vm1, %v396_v53  ;;  %v2233_v55 = vpack.c.bf16 %v423_v26, %v422_v54  ;;  %v391_v53 = vunpack.c.3.s8 %v378_v45  ;;  %v392_v26 = vunpack.c.0.s8 %v379_v52 }
 0x139   : > { %v405_v23 = vcvt.s32.f32 %v389_v20 }
 0x13a   : > { %2027 = vmatmul.mubr.f32.vlgmr.msra.gmra.mrb[16].mxu1 %v417_v51  ;;  %v390_v51 = vunpack.c.2.s8 %v378_v45 }
 0x13b   : > { %2232 = vmatpush3.bf16.msra.mxu1 %v2229_v50  ;;  %v404_v50 = vcvt.s32.f32 %v388_v48 }
 0x13c   : > { %2234 = vmatprep.subr.bf16.mxu1 %v2233_v55  ;;  %v406_v54 = vcvt.s32.f32 %v390_v51 }
 0x1ed   : > { %v1972_v56 = vpop.f32.mrb[0].mxu1 }
 0x1ee   : > { %v644_v57 = vpop.f32.mrb[1].mxu1 }
 0x1ef   : > { %2089 = vmatprep.mubr.msk.f32.mxu1 %vm798_vm1, %v644_v57  ;;  %v408_v57 = vcvt.s32.f32 %v392_v26 }
 0x1f0   : > { %2090 = vmatmul.mubr.msk.f32.vlgmr.msra.gmra.mrb[18].mxu1 %vm798_vm1, %v1972_v56  ;;  %v393_v56 = vunpack.c.1.s8 %v379_v52 }
 0x1f1   : > { %v1975_v58 = vpop.f32.mrb[2].mxu1  ;;  %2236 = vmatpush3.bf16.msra.mxu1 %v2233_v55  ;;  %v407_v55 = vcvt.s32.f32 %v391_v53 }
 0x1f2   : > { %v654_v59 = vpop.f32.mrb[3].mxu1 }
 0x1f3   : > { %2092 = vmatprep.mubr.msk.f32.mxu1 %vm798_vm1, %v654_v59  ;;  %v409_v59 = vcvt.s32.f32 %v393_v56 }
 0x1f4   : > { %2093 = vmatmul.mubr.msk.f32.gmra.mrb[20].mxu1 %vm798_vm1, %v1975_v58  ;;  %v394_v58 = vunpack.c.2.s8 %v379_v52 }
 0x1f5   : > { %v1978_v60 = vpop.f32.mrb[4].mxu1 }
 0x1f6   : > { %v664_v61 = vpop.f32.mrb[5].mxu1 }
 0x1f7   : > { %2095 = vmatprep.mubr.msk.f32.mxu1 %vm798_vm1, %v664_v61  ;;  %v410_v61 = vcvt.s32.f32 %v394_v58 }
 0x1f8   : > { %2096 = vmatmul.mubr.msk.f32.gmra.mrb[22].mxu1 %vm798_vm1, %v1978_v60  ;;  %v395_v60 = vunpack.c.3.s8 %v379_v52 }
 0x1f9   : > { %v1981_v62 = vpop.f32.mrb[6].mxu1 }
 0x1fa   : > { %v674_v63 = vpop.f32.mrb[7].mxu1 }
 0x1fb   : > { %2098 = vmatprep.mubr.msk.f32.mxu1 %vm798_vm1, %v674_v63 }
 0x1fc   : > { %2099 = vmatmul.mubr.msk.f32.gmra.mrb[24].mxu1 %vm798_vm1, %v1981_v62  ;;  %v411_v62 = vcvt.s32.f32 %v395_v60 }
 0x1fd   : > { %v1984_v0 = vpop.f32.mrb[8].mxu1 }
 0x1fe   : > { %v684_v1 = vpop.f32.mrb[9].mxu1 }
 0x1ff   : > { %2101 = vmatprep.mubr.msk.f32.mxu1 %vm798_vm1, %v684_v1 }
 0x200   : > { %2102 = vmatmul.mubr.msk.f32.gmra.mrb[26].mxu1 %vm798_vm1, %v1984_v0 }
 0x201   : > { %v1987_v2 = vpop.f32.mrb[10].mxu1 }
 0x202   : > { %v694_v27 = vpop.f32.mrb[11].mxu1 }
 0x203   : > { %2104 = vmatprep.mubr.msk.f32.mxu1 %vm798_vm1, %v694_v27 }
 0x204   : > { %2105 = vmatmul.mubr.msk.f32.gmra.mrb[28].mxu1 %vm798_vm1, %v1987_v2 }
 0x205   : > { %v1990_v28 = vpop.f32.mrb[12].mxu1 }
 0x206   : > { %v704_v29 = vpop.f32.mrb[13].mxu1 }
 0x207   : > { %2107 = vmatprep.mubr.msk.f32.mxu1 %vm798_vm1, %v704_v29 }
 0x208   : > { %2108 = vmatmul.mubr.msk.f32.gmra.mrb[30].mxu1 %vm798_vm1, %v1990_v28 }
 0x209   : > { %v1993_v30 = vpop.f32.mrb[14].mxu1 }
 0x20a   : > { %v714_v31 = vpop.f32.mrb[15].mxu1 }
 0x20b   : > { %2110 = vmatprep.mubr.msk.f32.mxu1 %vm798_vm1, %v714_v31 }
 0x20c   : > { %2111 = vmatmul.mubr.msk.f32.gmra.mrb[32].mxu1 %vm798_vm1, %v1993_v30 }
 0x20d   : > { %v2028_v33 = vpop.f32.mrb[16].mxu1 }
 0x20e   : > { %v789_v35 = vpop.f32.mrb[17].mxu1 }
 0x20f   : > { %v2221_v36 = vpack.c.bf16 %v2028_v33, %v789_v35 }
 0x211   : > { %2222 = vmatprep.subr.bf16.mxu0 %v2221_v36 }
 0x212   : > { %2224 = vmatpush3.bf16.msra.mxu0 %v2221_v36 }
 0x213   : > { %2226 = vmatprep.subr.bf16.mxu0 %v2225_v38 }
 0x215   : > { %2034 = vmatmul.mubr.msk.f32.vlgmr.msra.gmra.mrb[8].mxu0 %vm798_vm1, %v397_v11 }
 0x216   : > { %2036 = vmatprep.mubr.msk.f32.mxu0 %vm798_vm1, %v398_v40  ;;  %2228 = vmatpush3.bf16.msra.mxu0 %v2225_v38 }
 0x219   : > { %2037 = vmatmul.mubr.msk.f32.gmra.mrb[10].mxu0 %vm798_vm1, %v399_v42 }
 0x21a   : > { %2039 = vmatprep.mubr.msk.f32.mxu0 %vm798_vm1, %v400_v43 }
 0x21d   : > { %2040 = vmatmul.mubr.msk.f32.gmra.mrb[12].mxu0 %vm798_vm1, %v401_v17 }
 0x21e   : > { %2042 = vmatprep.mubr.msk.f32.mxu0 %vm798_vm1, %v402_v47 }
 0x221   : > { %2043 = vmatmul.mubr.msk.f32.gmra.mrb[14].mxu0 %vm798_vm1, %v403_v49 }
 0x222   : > { %2045 = vmatprep.mubr.msk.f32.mxu0 %vm798_vm1, %v404_v50 }
 0x225   : > { %2046 = vmatmul.mubr.msk.f32.gmra.mrb[16].mxu0 %vm798_vm1, %v405_v23 }
 0x226   : > { %2048 = vmatprep.mubr.msk.f32.mxu0 %vm798_vm1, %v406_v54 }
 0x229   : > { %2049 = vmatmul.mubr.msk.f32.gmra.mrb[18].mxu0 %vm798_vm1, %v407_v55 }
 0x22a   : > { %2051 = vmatprep.mubr.msk.f32.mxu0 %vm798_vm1, %v408_v57 }
 0x22d   : > { %2052 = vmatmul.mubr.msk.f32.gmra.mrb[20].mxu0 %vm798_vm1, %v409_v59 }
 0x22e   : > { %2054 = vmatprep.mubr.msk.f32.mxu0 %vm798_vm1, %v410_v61 }
 0x231   : > { %2055 = vmatmul.mubr.msk.f32.gmra.mrb[22].mxu0 %vm798_vm1, %v411_v62 }
 0x232   : > { %2061 = vmatprep.mubr.msk.f32.mxu0 %vm798_vm1, %v2384_v3 }
 0x235   : > { %2062 = vmatmul.mubr.msk.f32.vlgmr.msra.gmra.mrb[24].mxu0 %vm798_vm1, %v2387_v4 }
 0x236   : > { %2064 = vmatprep.mubr.msk.f32.mxu0 %vm798_vm1, %v2390_v5 }
 0x239   : > { %2065 = vmatmul.mubr.msk.f32.gmra.mrb[26].mxu0 %vm798_vm1, %v2397_v7 }
 0x23a   : > { %2067 = vmatprep.mubr.msk.f32.mxu0 %vm798_vm1, %v2404_v9 }
 0x23d   : > { %2068 = vmatmul.mubr.msk.f32.gmra.mrb[28].mxu0 %vm798_vm1, %v2407_v10 }
 0x23e   : > { %2070 = vmatprep.mubr.msk.f32.mxu0 %vm798_vm1, %v2417_v12 }
 0x241   : > { %2071 = vmatmul.mubr.msk.f32.gmra.mrb[30].mxu0 %vm798_vm1, %v2420_v13 }
 0x242   : > { %2073 = vmatprep.mubr.msk.f32.mxu0 %vm798_vm1, %v2429_v15 }
 0x245   : > { %2074 = vmatmul.mubr.msk.f32.gmra.mrb[32].mxu0 %vm798_vm1, %v2432_v16 }
 0x246   : > { %2076 = vmatprep.mubr.msk.f32.mxu0 %vm798_vm1, %v2441_v18 }
 0x249   : > { %2077 = vmatmul.mubr.msk.f32.gmra.mrb[34].mxu0 %vm798_vm1, %v2444_v19 }
 0x24a   : > { %2079 = vmatprep.mubr.msk.f32.mxu0 %vm798_vm1, %v2453_v21 }
 0x24d   : > { %2080 = vmatmul.mubr.msk.f32.gmra.mrb[36].mxu0 %vm798_vm1, %v2456_v22 }
 0x24e   : > { %2082 = vmatprep.mubr.msk.f32.mxu0 %vm798_vm1, %v2465_v24 }
 0x251   : > { %2083 = vmatmul.mubr.msk.f32.gmra.mrb[38].mxu0 %vm798_vm1, %v2468_v25 }
 0x2e8   : > { %v2035_v3 = vpop.f32.mrb[8].mxu0 }
 0x2e9   : > { %v913_v4 = vpop.f32.mrb[9].mxu0 }
 0x2ea   : > { %2117 = vmatprep.mubr.msk.f32.mxu1 %vm798_vm1, %v913_v4 }
 0x2eb   : > { %2118 = vmatmul.mubr.msk.f32.vlgmr.msra.gmra.mrb[18].mxu1 %vm798_vm1, %v2035_v3 }
 0x2ec   : > { %v2038_v5 = vpop.f32.mrb[10].mxu0 }
 0x2ed   : > { %v923_v7 = vpop.f32.mrb[11].mxu0 }
 0x2ee   : > { %2120 = vmatprep.mubr.msk.f32.mxu1 %vm798_vm1, %v923_v7 }
 0x2ef   : > { %2121 = vmatmul.mubr.msk.f32.gmra.mrb[20].mxu1 %vm798_vm1, %v2038_v5 }
 0x2f0   : > { %v2041_v9 = vpop.f32.mrb[12].mxu0 }
 0x2f1   : > { %v933_v10 = vpop.f32.mrb[13].mxu0 }
 0x2f2   : > { %2123 = vmatprep.mubr.msk.f32.mxu1 %vm798_vm1, %v933_v10 }
 0x2f3   : > { %2124 = vmatmul.mubr.msk.f32.gmra.mrb[22].mxu1 %vm798_vm1, %v2041_v9 }
 0x2f4   : > { %v2044_v12 = vpop.f32.mrb[14].mxu0 }
 0x2f5   : > { %v943_v13 = vpop.f32.mrb[15].mxu0 }
 0x2f6   : > { %2126 = vmatprep.mubr.msk.f32.mxu1 %vm798_vm1, %v943_v13 }
 0x2f7   : > { %2127 = vmatmul.mubr.msk.f32.gmra.mrb[24].mxu1 %vm798_vm1, %v2044_v12 }
 0x2f8   : > { %v2047_v15 = vpop.f32.mrb[16].mxu0 }
 0x2f9   : > { %v953_v16 = vpop.f32.mrb[17].mxu0 }
 0x2fa   : > { %2129 = vmatprep.mubr.msk.f32.mxu1 %vm798_vm1, %v953_v16 }
 0x2fb   : > { %2130 = vmatmul.mubr.msk.f32.gmra.mrb[26].mxu1 %vm798_vm1, %v2047_v15 }
 0x2fc   : > { %v2050_v18 = vpop.f32.mrb[18].mxu0 }
 0x2fd   : > { %v963_v19 = vpop.f32.mrb[19].mxu0 }
 0x2fe   : > { %2132 = vmatprep.mubr.msk.f32.mxu1 %vm798_vm1, %v963_v19 }
 0x2ff   : > { %2133 = vmatmul.mubr.msk.f32.gmra.mrb[28].mxu1 %vm798_vm1, %v2050_v18 }
 0x300   : > { %v2053_v21 = vpop.f32.mrb[20].mxu0 }
 0x301   : > { %v973_v22 = vpop.f32.mrb[21].mxu0 }
 0x302   : > { %2135 = vmatprep.mubr.msk.f32.mxu1 %vm798_vm1, %v973_v22 }
 0x303   : > { %2136 = vmatmul.mubr.msk.f32.gmra.mrb[30].mxu1 %vm798_vm1, %v2053_v21 }
 0x304   : > { %v2056_v24 = vpop.f32.mrb[22].mxu0 }
 0x305   : > { %v983_v25 = vpop.f32.mrb[23].mxu0 }
 0x306   : > { %2138 = vmatprep.mubr.msk.f32.mxu1 %vm798_vm1, %v983_v25 }
 0x307   : > { %2139 = vmatmul.mubr.msk.f32.gmra.mrb[32].mxu1 %vm798_vm1, %v2056_v24 }
 0x308   : > { %v2063_v63 = vpop.f32.mrb[24].mxu0 }
 0x309   : > { %v1106_v0 = vpop.f32.mrb[25].mxu0 }
 0x30c   : > { %v2066_v1 = vpop.f32.mrb[26].mxu0 }
 0x30d   : > { %v1116_v2 = vpop.f32.mrb[27].mxu0 }
 0x310   : > { %v2069_v27 = vpop.f32.mrb[28].mxu0 }
 0x311   : > { %v1126_v28 = vpop.f32.mrb[29].mxu0 }
 0x314   : > { %v2072_v29 = vpop.f32.mrb[30].mxu0 }
 0x315   : > { %v1136_v30 = vpop.f32.mrb[31].mxu0 }
 0x318   : > { %v2075_v31 = vpop.f32.mrb[32].mxu0 }
 0x319   : > { %v1146_v6 = vpop.f32.mrb[33].mxu0 }
 0x31c   : > { %v2078_v32 = vpop.f32.mrb[34].mxu0 }
 0x31d   : > { %v1156_v33 = vpop.f32.mrb[35].mxu0 }
 0x320   : > { %v2081_v34 = vpop.f32.mrb[36].mxu0 }
 0x321   : > { %v1166_v35 = vpop.f32.mrb[37].mxu0 }
 0x324   : > { %v2639_v8 = vpop.f32.mrb[38].mxu0 }
 0x325   : > { %v2641_v36 = vpop.f32.mrb[39].mxu0 }
 0x3be   : > { %v2119_v37 = vpop.f32.mrb[18].mxu1 }
 0x3bf   : > { %v2237_v38 = vadd.f32 %v2119_v37, %v2063_v63  ;;  %v1492_v11 = vpop.f32.mrb[19].mxu1 }
 0x3c0   : > { %v2238_v39 = vadd.f32 %v1492_v11, %v1106_v0 }
 0x3c1   : > { %2277 = vtanh.f32 %v2237_v38 }
 0x3c2   : > { %2279 = vtanh.f32 %v2238_v39  ;;  %v2122_v40 = vpop.f32.mrb[20].mxu1 }
 0x3c3   : > { %v2239_v41 = vadd.f32 %v2122_v40, %v2066_v1  ;;  %v1502_v42 = vpop.f32.mrb[21].mxu1 }
 0x3c4   : > { %v2240_v14 = vadd.f32 %v1502_v42, %v1116_v2 }
 0x3c5   : > { %2281 = vtanh.f32 %v2239_v41 }
 0x3c6   : > { %2283 = vtanh.f32 %v2240_v14  ;;  %v2125_v43 = vpop.f32.mrb[22].mxu1 }
 0x3c7   : > { %v2241_v44 = vadd.f32 %v2125_v43, %v2069_v27  ;;  %v1512_v45 = vpop.f32.mrb[23].mxu1 }
 0x3c8   : > { %v2242_v17 = vadd.f32 %v1512_v45, %v1126_v28 }
 0x3c9   : > { %2285 = vtanh.f32 %v2241_v44 }
 0x3ca   : > { %2287 = vtanh.f32 %v2242_v17  ;;  %v2128_v46 = vpop.f32.mrb[24].mxu1 }
 0x3cb   : > { %v2278_v47 = vpop.eup %2277  ;;  %v2243_v48 = vadd.f32 %v2128_v46, %v2072_v29  ;;  %v1522_v49 = vpop.f32.mrb[25].mxu1 }
 0x3cc   : > { %v2280_v20 = vpop.eup %2279  ;;  %1605 = vst.msk [vmem:[%s2648_s30 + $0x8] sm:$0xff] %vm1603_vm2, %v2278_v47  ;;  %v2244_v50 = vadd.f32 %v1522_v49, %v1136_v30 }
 0x3cd   : > { %1604 = vst.msk [vmem:[%s2648_s30] sm:$0xff] %vm1603_vm2, %v2280_v20  ;;  %2289 = vtanh.f32 %v2243_v48 }
 0x3ce   : > { %2291 = vtanh.f32 %v2244_v50  ;;  %v2131_v51 = vpop.f32.mrb[26].mxu1 }
 0x3cf   : > { %v2282_v52 = vpop.eup %2281  ;;  %v2245_v23 = vadd.f32 %v2131_v51, %v2075_v31  ;;  %v1532_v53 = vpop.f32.mrb[27].mxu1 }
 0x3d0   : > { %v2284_v54 = vpop.eup %2283  ;;  %1607 = vst.msk [vmem:[%s2648_s30 + $0x18] sm:$0xff] %vm1603_vm2, %v2282_v52  ;;  %v2246_v26 = vadd.f32 %v1532_v53, %v1146_v6 }
 0x3d1   : > { %1606 = vst.msk [vmem:[%s2648_s30 + $0x10] sm:$0xff] %vm1603_vm2, %v2284_v54  ;;  %2293 = vtanh.f32 %v2245_v23 }
 0x3d2   : > { %2295 = vtanh.f32 %v2246_v26  ;;  %v2134_v55 = vpop.f32.mrb[28].mxu1 }
 0x3d3   : > { %v2286_v56 = vpop.eup %2285  ;;  %v2247_v57 = vadd.f32 %v2134_v55, %v2078_v32  ;;  %v1542_v58 = vpop.f32.mrb[29].mxu1 }
 0x3d4   : > { %v2288_v59 = vpop.eup %2287  ;;  %1609 = vst.msk [vmem:[%s2648_s30 + $0x28] sm:$0xff] %vm1603_vm2, %v2286_v56  ;;  %v2248_v60 = vadd.f32 %v1542_v58, %v1156_v33 }
 0x3d5   : > { %1608 = vst.msk [vmem:[%s2648_s30 + $0x20] sm:$0xff] %vm1603_vm2, %v2288_v59  ;;  %2297 = vtanh.f32 %v2247_v57 }
 0x3d6   : > { %2299 = vtanh.f32 %v2248_v60  ;;  %v2137_v61 = vpop.f32.mrb[30].mxu1 }
 0x3d7   : > { %v2290_v62 = vpop.eup %2289  ;;  %v2249_v3 = vadd.f32 %v2137_v61, %v2081_v34  ;;  %v1552_v4 = vpop.f32.mrb[31].mxu1 }
 0x3d8   : > { %v2292_v5 = vpop.eup %2291  ;;  %1611 = vst.msk [vmem:[%s2648_s30 + $0x38] sm:$0xff] %vm1603_vm2, %v2290_v62  ;;  %v2250_v7 = vadd.f32 %v1552_v4, %v1166_v35 }
 0x3d9   : > { %1610 = vst.msk [vmem:[%s2648_s30 + $0x30] sm:$0xff] %vm1603_vm2, %v2292_v5  ;;  %2301 = vtanh.f32 %v2249_v3 }
 0x3da   : > { %2303 = vtanh.f32 %v2250_v7  ;;  %v2140_v9 = vpop.f32.mrb[32].mxu1 }
 0x3db   : > { %v2294_v10 = vpop.eup %2293  ;;  %v2251_v12 = vadd.f32 %v2140_v9, %v2639_v8  ;;  %v1562_v13 = vpop.f32.mrb[33].mxu1 }
 0x3dc   : > { %v2296_v15 = vpop.eup %2295  ;;  %1613 = vst.msk [vmem:[%s2648_s30 + $0x48] sm:$0xff] %vm1603_vm2, %v2294_v10  ;;  %v2252_v16 = vadd.f32 %v1562_v13, %v2641_v36 }
 0x3dd   : > { %1612 = vst.msk [vmem:[%s2648_s30 + $0x40] sm:$0xff] %vm1603_vm2, %v2296_v15  ;;  %2305 = vtanh.f32 %v2251_v12 }
 0x3de   : > { %2307 = vtanh.f32 %v2252_v16 }
 0x3df   : > { %v2298_v18 = vpop.eup %2297 }
 0x3e0   : > { %v2300_v19 = vpop.eup %2299  ;;  %1615 = vst.msk [vmem:[%s2648_s30 + $0x58] sm:$0xff] %vm1603_vm2, %v2298_v18 }
 0x3e1   : > { %1614 = vst.msk [vmem:[%s2648_s30 + $0x50] sm:$0xff] %vm1603_vm2, %v2300_v19 }
 0x3e3   : > { %v2302_v21 = vpop.eup %2301 }
 0x3e4   : > { %v2304_v22 = vpop.eup %2303  ;;  %1617 = vst.msk [vmem:[%s2648_s30 + $0x68] sm:$0xff] %vm1603_vm2, %v2302_v21 }
 0x3e5   : > { %1616 = vst.msk [vmem:[%s2648_s30 + $0x60] sm:$0xff] %vm1603_vm2, %v2304_v22 }
 0x3e7   : > { %v2306_v24 = vpop.eup %2305 }
 0x3e8   : > { %v2308_v25 = vpop.eup %2307  ;;  %1619 = vst.msk [vmem:[%s2648_s30 + $0x78] sm:$0xff] %vm1603_vm2, %v2306_v24 }
 0x3e9   : > { %1618 = vst.msk [vmem:[%s2648_s30 + $0x70] sm:$0xff] %vm1603_vm2, %v2308_v25 }
 0x3ea PF: > { %s18_s27 = sadd.s32 1, %s2315_s27  }
 0x3eb   : > { %p15_p4 = scmp.ge.s32.totalorder %s18_s27, 6  }
 0x3ed   :  { %17 = sbr.rel (!%p15_p4) target bundleno = 1 (0x1), region = 82 }

</bundles_post_ra>
